<compile_context>
chip_gen: v7x
topology: tpu7x:2x2x1
jax: 0.10.0
libtpu: 0.0.40
codegen_flags: <defaults>
</compile_context>

<pallas_src>
import functools
import math

import jax
import jax.numpy as jnp
import numpy as np
from jax import lax
from jax.experimental import pallas as pl
from jax.experimental.pallas import tpu as pltpu

NEG_INF = float("-inf")


def _round_up(x, m):
    return ((x + m - 1) // m) * m


# ---------------------------------------------------------------------------
# Kernel 1: gate linear + logsigmoid pair  (controls = [log rho, log(1-rho)])
# ---------------------------------------------------------------------------
def _gate_kernel(x_ref, w_ref, b_ref, s_ref, d_ref):
    x = x_ref[...]                                    # (C, TILE): C on sublanes, rows on lanes
    w = w_ref[...]                                    # (C, 1)
    g = jnp.sum(x * w, axis=0, keepdims=True) + b_ref[0, 0]   # (1, TILE), lane-dense
    s = jnp.minimum(g, 0.0) - jnp.log1p(jnp.exp(-jnp.abs(g)))  # stable log-sigmoid
    s_ref[...] = s                                    # log sigmoid(g)      = log rho
    d_ref[...] = s - g                                # log(1 - sigmoid(g)) = log(1-rho)


def gate_logsigmoid_pair(xT, w_col, b):
    """xT: (C, rows) decoder states (transposed). Returns (rows,) log rho / log(1-rho)."""
    C, rows = xT.shape
    target_block_bytes = 2 * 1024 * 1024
    tile = max(128, min(32768, (target_block_bytes // (4 * C)) // 128 * 128))
    tile = min(tile, _round_up(rows, 128))
    rows_pad = _round_up(rows, tile)
    if rows_pad != rows:
        xT = jnp.pad(xT, ((0, 0), (0, rows_pad - rows)))
    ntiles = rows_pad // tile
    out_sd = jax.ShapeDtypeStruct((1, rows_pad), jnp.float32)
    s, d = pl.pallas_call(
        _gate_kernel,
        out_shape=(out_sd, out_sd),
        grid=(ntiles,),
        in_specs=[pl.BlockSpec((C, tile), lambda i: (0, i)),
                  pl.BlockSpec((C, 1), lambda i: (0, 0)),
                  pl.BlockSpec(memory_space=pltpu.MemorySpace.SMEM)],
        out_specs=(pl.BlockSpec((1, tile), lambda i: (0, i)),
                   pl.BlockSpec((1, tile), lambda i: (0, i))),
        compiler_params=pltpu.CompilerParams(dimension_semantics=("parallel",)),
    )(xT, w_col, b)
    return s[0, :rows], d[0, :rows]


# ---------------------------------------------------------------------------
# Kernel 2: HMM forward/backward + gamma / ksi-read / write.
# No (Ts,Ts) transition matrices: everything factors through exclusive prefix
# sums of log-rho and cumulative log-sum-exps along the lane (source) axis,
# built from log2(Ts) pltpu.roll steps.  Two fori_loop passes over VMEM scratch.
# ---------------------------------------------------------------------------
def _hmm_kernel(cr_ref, cw_ref, e_ref, *refs, bias_emission, before_after):
    alpha_scr, clse_scr, S_scr = refs[-3:]
    out_refs = refs[:-3]
    if len(out_refs) == 4:
        eout_ref, gamma_ref, read_ref, write_ref = out_refs
    else:
        eout_ref, gamma_ref = out_refs
        read_ref = write_ref = None

    Tt, B, Ts = cr_ref.shape
    f32 = jnp.float32

    col = lax.broadcasted_iota(jnp.int32, (B, Ts), 1)            # source position
    is_last = col == Ts - 1
    is_first = col == 0

    # hoisted roll masks, reused by every scan call and every t
    shifts = []
    d = 1
    while d < Ts:
        shifts.append(d)
        d *= 2
    fwd_keep = [col >= s for s in shifts]
    bwd_keep = [col < Ts - s for s in shifts]

    def cumsum_inc(x):                    # inclusive prefix sum over lanes (XLU rolls)
        for s, keep in zip(shifts, fwd_keep):
            x = x + jnp.where(keep, pltpu.roll(x, s, 1), 0.0)
        return x

    def rcumsum_inc(x):                   # inclusive suffix sum over lanes
        for s, keep in zip(shifts, bwd_keep):
            x = x + jnp.where(keep, pltpu.roll(x, Ts - s, 1), 0.0)
        return x

    def _safe_max(x):
        m = jnp.max(x, axis=1, keepdims=True)
        return jnp.where(m == NEG_INF, 0.0, m)

    # TODO(synk): single row-wide max stabilization can underflow prefixes sitting
    #             ~88+ below the row max to -inf; switch to a pairwise-LSE scan if
    #             that regime matters at production Ts (costs ~log2(Ts)x more EUP).
    def cum_lse(x):                       # log sum_{k<=j} exp(x[k])
        m = _safe_max(x)
        return jnp.log(cumsum_inc(jnp.exp(x - m))) + m

    def rcum_lse(x):                      # log sum_{l>=j} exp(x[l])
        m = _safe_max(x)
        return jnp.log(rcumsum_inc(jnp.exp(x - m))) + m

    def lse_row(x):                       # (B, 1) logsumexp over lanes
        m = _safe_max(x)
        return jnp.log(jnp.sum(jnp.exp(x - m), axis=1, keepdims=True)) + m

    def load_e(t):
        e_row = e_ref[t]
        if bias_emission:
            e_row = e_row - bias_emission * col.astype(f32)
        return e_row

    def load_cw(t):
        return jnp.where(is_last, 0.0, cw_ref[t])

    def load_S(t):                        # exclusive prefix sum of masked log-rho
        cr_row = jnp.where(is_last, 0.0, cr_ref[t])
        inc = cumsum_inc(cr_row)
        return jnp.where(is_first, 0.0, pltpu.roll(inc, 1, 1))

    # ---- forward pass:  alpha[i] = e[i] + cw[i-1] + S[i-1] + cum_lse(alpha[i-1]-S[i-1])
    e0 = load_e(0)
    eout_ref[0] = e0
    S0 = load_S(0)
    cw0 = load_cw(0)
    alpha0 = e0 + jnp.where(is_first, 0.0, NEG_INF)
    alpha_scr[0] = alpha0
    S_scr[0] = S0

    def fwd_body(i, carry):
        alpha_prev, S_prev, cw_prev = carry
        clse = cum_lse(alpha_prev - S_prev)
        clse_scr[i - 1] = clse
        e_i = load_e(i)
        eout_ref[i] = e_i
        alpha_i = e_i + cw_prev + S_prev + clse
        alpha_scr[i] = alpha_i
        S_i = load_S(i)
        S_scr[i] = S_i
        return alpha_i, S_i, load_cw(i)

    alpha_last, _, _ = lax.fori_loop(1, Tt, fwd_body, (alpha0, S0, cw0))
    prior = lse_row(alpha_last)                                   # (B, 1)

    def maybe_cumsum(g):
        return cumsum_inc(g) if before_after else g

    gamma_last = maybe_cumsum(jnp.exp(alpha_last - prior))
    gamma_ref[Tt - 1] = gamma_last

    # ---- backward pass: carries only beta[t+1] (and gamma[t+1] for write)
    if read_ref is not None:
        def bwd_body(k, carry):
            beta_next, gamma_next = carry
            t = Tt - 2 - k
            S_t = S_scr[t]
            cw_t = jnp.where(is_last, 0.0, cw_ref[t])
            r = rcum_lse(cw_t + S_t + beta_next + eout_ref[t + 1])   # = bwd_rlse[t]
            beta_t = r - S_t
            gamma_t = maybe_cumsum(jnp.exp(alpha_scr[t] + beta_t - prior))
            gamma_ref[t] = gamma_t
            write_ref[t] = gamma_next
            # read[t,j] = sum_{k<=j} sum_{l>j} ksi_t[k,l]
            #           = exp( cum_lse(alpha[t]-S[t])[j] + rlse_{l>j}(.) - prior )
            rexc = jnp.where(is_last, NEG_INF, pltpu.roll(r, Ts - 1, 1))
            read_ref[t] = jnp.exp(clse_scr[t] + rexc - prior)
            return beta_t, gamma_t

        lax.fori_loop(0, Tt - 1, bwd_body,
                      (jnp.zeros((B, Ts), f32), gamma_last))
    # TODO(synk): the PyTorch forward also prints Write/Read sums (pure side effect).
    # TODO(synk): when Ts < 128, pack 128//Ts batch rows along the lane axis (pure
    #             reshape in the wrapper, per-segment masks) to fill vregs.


def _pick_batch_block(npad, Tt, Ts, budget_bytes=40 * 1024 * 1024):
    """npad is a multiple of 8 and >= 16; keep grid >= 2 and fit the VMEM budget."""
    b = 8
    while (npad % (2 * b) == 0 and 2 * b <= npad // 2
           and 68 * Tt * (2 * b) * Ts <= budget_bytes):   # ~17 live (Tt,B,Ts) f32 planes
        b *= 2
    return b


def hmm_forward_backward(cr, cw, e, *, n_valid, bias_emission=0.0, before_after=False):
    """Inputs are target-major (Tt, Npad, Ts); outputs sliced back to n_valid."""
    Tt, Npad, Ts = e.shape
    B = _pick_batch_block(Npad, Tt, Ts)
    kernel = functools.partial(_hmm_kernel, bias_emission=bias_emission,
                               before_after=before_after)
    spec_full = pl.BlockSpec((Tt, B, Ts), lambda nb: (0, nb, 0))
    out_shape = [jax.ShapeDtypeStruct((Tt, Npad, Ts), jnp.float32),
                 jax.ShapeDtypeStruct((Tt, Npad, Ts), jnp.float32)]
    out_specs = [spec_full, spec_full]
    if Tt > 1:
        spec_m1 = pl.BlockSpec((Tt - 1, B, Ts), lambda nb: (0, nb, 0))
        out_shape += [jax.ShapeDtypeStruct((Tt - 1, Npad, Ts), jnp.float32)] * 2
        out_specs += [spec_m1, spec_m1]
    plane_bytes = 4 * Tt * B * Ts
    vmem_limit = int(min(48 * 1024 * 1024,
                         max(32 * 1024 * 1024, int(17 * plane_bytes * 1.25))))
    outs = pl.pallas_call(
        kernel,
        out_shape=tuple(out_shape),
        grid=(Npad // B,),
        in_specs=[spec_full, spec_full, spec_full],
        out_specs=tuple(out_specs),
        scratch_shapes=[pltpu.VMEM((Tt, B, Ts), jnp.float32)] * 3,   # alpha, fwd_clse, S
        compiler_params=pltpu.CompilerParams(
            dimension_semantics=("parallel",),
            vmem_limit_bytes=vmem_limit),
    )(cr, cw, e)
    outs = [o[:, :n_valid] for o in outs]
    if Tt > 1:
        return tuple(outs)
    eout, gamma = outs
    empty = jnp.zeros((0, n_valid, Ts), jnp.float32)
    return eout, gamma, empty, empty


# ---------------------------------------------------------------------------
# Full forward (wrapper glue: one vectorized scatter per grid, built directly
# target-major; batch padded so the HMM grid always has >= 2 programs)
# ---------------------------------------------------------------------------
def dynamic_controls_forward(x_list, em_list, indices, src_length, gate_w, gate_b,
                             *, bias_emission=0.0, before_after=False):
    Tt = len(x_list)
    N = x_list[0].shape[0]
    C = x_list[0].shape[-1]
    Ts = src_length

    # ---- gate on the concatenated (un-padded) contexts, rows on lanes ----
    x_cat = jnp.concatenate([x.astype(jnp.float32) for x in x_list], axis=1)  # (N, sum_ct, C)
    sum_ct = x_cat.shape[1]
    rows = N * sum_ct
    xT = x_cat.reshape(rows, C).T                                             # (C, rows)
    s_flat, d_flat = gate_logsigmoid_pair(
        xT,
        jnp.asarray(gate_w, jnp.float32).reshape(C, 1),
        jnp.asarray(gate_b, jnp.float32).reshape(1, 1))
    s_mat = s_flat.reshape(N, sum_ct)
    d_mat = d_flat.reshape(N, sum_ct)
    e_cat = jnp.concatenate([e.astype(jnp.float32) for e in em_list], axis=1)  # (N, sum_ct)

    # ---- pad batch: >= 2 grid programs on v7x, B multiple of 8 ----
    Npad = max(16, _round_up(N, 8))
    pad = ((0, Npad - N), (0, 0))
    s_pad = jnp.pad(s_mat, pad)
    d_pad = jnp.pad(d_mat, pad)
    e_pad = jnp.pad(e_cat, pad)

    # ---- one vectorized scatter per grid, directly target-major (Tt, Npad, Ts) ----
    t_all = jnp.concatenate([jnp.full((int(indices[t].shape[0]),), t, jnp.int32)
                             for t in range(Tt)])
    s_all = jnp.concatenate([jnp.asarray(indices[t], jnp.int32) for t in range(Tt)])
    triu = jnp.triu(jnp.ones((Tt, Ts), jnp.float32), 1) > 0
    cw_bg = jnp.where(triu, 0.0, NEG_INF).astype(jnp.float32)[:, None, :]

    cr_tm = jnp.zeros((Tt, Npad, Ts), jnp.float32).at[t_all, :, s_all].set(s_pad.T)
    cw_tm = jnp.broadcast_to(cw_bg, (Tt, Npad, Ts)).at[t_all, :, s_all].set(d_pad.T)
    e_tm = jnp.full((Tt, Npad, Ts), NEG_INF, jnp.float32).at[t_all, :, s_all].set(e_pad.T)

    # controls grid returned by the module (already target-major; no transposes)
    controls_grid = jnp.stack([cr_tm[:, :N], cw_tm[:, :N]], axis=-1)          # (Tt, N, Ts, 2)

    emissions_out, gamma, read, write = hmm_forward_backward(
        cr_tm, cw_tm, e_tm, n_valid=N,
        bias_emission=bias_emission, before_after=before_after)
    return emissions_out, gamma, controls_grid[:-1], read, write


# ---------------------------------------------------------------------------
# Pure numpy reference (mirrors the PyTorch module literally)
# ---------------------------------------------------------------------------
def reference_forward(x_list, em_list, indices, Ts, W, b,
                      bias_emission=0.0, before_after=False):
    Tt = len(x_list)
    N = x_list[0].shape[0]
    W = np.asarray(W, np.float64)
    b0 = float(np.asarray(b)[0, 0])

    def logsigmoid(v):
        return np.minimum(v, 0.0) - np.log(1.0 + np.exp(-np.abs(v)))

    controls = []
    for t in range(Tt):
        xt = np.asarray(x_list[t], np.float64)
        g = xt @ W + b0
        sg = logsigmoid(g)
        controls.append(np.concatenate([sg, sg - g], axis=-1))   # (N, ct, 2)

    Cread = np.zeros((Tt, Ts, N, 1))
    Cwrite = np.full_like(Cread, NEG_INF)
    tri = np.triu(np.ones((Tt, Ts)), 1).astype(bool)
    Cwrite[tri] = 0.0
    Cgrid = np.concatenate([Cread, Cwrite], axis=-1)
    E = np.full((Tt, Ts, N), NEG_INF)
    for t in range(Tt):
        idx = np.asarray(indices[t])
        Cgrid[t, idx] = np.transpose(controls[t], (1, 0, 2))
        E[t, idx] = np.asarray(em_list[t]).T
    Cgrid = np.transpose(Cgrid, (0, 2, 1, 3))             # (Tt, N, Ts, 2)
    E = np.transpose(E, (0, 2, 1))                        # (Tt, N, Ts)

    Cm = Cgrid.copy()
    Cm[:, :, -1, 0] = NEG_INF
    Cm[:, :, -1, 1] = 0.0
    M = np.full((Tt, N, Ts, Ts), NEG_INF)
    for k in range(Ts):
        for j in range(k, Ts):
            M[:, :, k, j] = Cm[:, :, j, 1] + np.sum(Cm[:, :, k:j, 0], axis=-1)
    if bias_emission:
        E = E - bias_emission * np.arange(Ts).reshape(1, 1, -1)

    def lse(a, axis):
        m = np.max(a, axis=axis, keepdims=True)
        ms = np.where(np.isneginf(m), 0.0, m)
        return np.squeeze(np.log(np.sum(np.exp(a - ms), axis=axis, keepdims=True)) + ms,
                          axis=axis)

    with np.errstate(divide="ignore", invalid="ignore", over="ignore"):
        alpha = np.full((Tt, N, Ts), NEG_INF)
        initial = np.full((N, Ts), NEG_INF)
        initial[:, 0] = 0.0
        alpha[0] = E[0] + initial
        for i in range(1, Tt):
            alpha[i] = lse(alpha[i - 1][:, :, None] + M[i - 1], axis=1) + E[i]
        beta = np.full((Tt, N, Ts), NEG_INF)
        beta[-1] = 0.0
        for i in range(Tt - 2, -1, -1):
            beta[i] = lse(np.transpose(M[i], (0, 2, 1)) + beta[i + 1][:, :, None]
                          + E[i + 1][:, :, None], axis=1)
        prior = lse(alpha[-1], axis=-1)[None, :, None]    # (1, N, 1)
        gamma = np.exp(alpha + beta - prior)
        ksi = np.exp(alpha[:-1][..., None] + beta[1:][:, :, None, :]
                     + E[1:][:, :, None, :] + M[:-1] - prior[..., None])
        if before_after:
            gamma = np.cumsum(gamma, axis=-1)
        write = gamma[1:]
        read = np.ones_like(write)
        for t in range(1, Tt):
            for j in range(Ts):
                read[t - 1, :, j] = ksi[t - 1, :, :j + 1, j + 1:].sum(-1).sum(-1)
    return E, gamma, Cgrid[:-1], read, write


# ---------------------------------------------------------------------------
if __name__ == "__main__":
    key = jax.random.PRNGKey(0)
    Tt, N, Ts, C = 8, 2, 8, 32
    ctx = [min(t + 1, Ts) for t in range(Tt)]
    keys = jax.random.split(key, 2 * Tt + 2)

    x_list = [jax.random.normal(keys[t], (N, ctx[t], C), jnp.float32)
              for t in range(Tt)]
    em_list = [0.5 * jax.random.normal(keys[Tt + t], (N, ctx[t]), jnp.float32)
               for t in range(Tt)]
    indices = [jnp.arange(ctx[t], dtype=jnp.int32) for t in range(Tt)]

    # deterministic gate parameters (xavier-ish weight, constant bias)
    limit = math.sqrt(6.0 / (C + 1))
    gate_w = jax.random.uniform(keys[2 * Tt], (C, 1), jnp.float32,
                                minval=-limit, maxval=limit)
    gate_b = jnp.full((1, 1), 0.5, jnp.float32)           # args.init_control_gate_bias

    outs = dynamic_controls_forward(x_list, em_list, indices, Ts, gate_w, gate_b,
                                    bias_emission=0.0, before_after=False)
    outs = jax.block_until_ready(outs)
    em_k, gamma_k, ctrl_k, read_k, write_k = [np.asarray(o) for o in outs]

    em_r, gamma_r, ctrl_r, read_r, write_r = reference_forward(
        x_list, em_list, indices, Ts, gate_w, gate_b,
        bias_emission=0.0, before_after=False)

    np.testing.assert_allclose(em_k, em_r, rtol=2e-3, atol=2e-4)
    np.testing.assert_allclose(ctrl_k, ctrl_r, rtol=2e-3, atol=2e-4)
    np.testing.assert_allclose(gamma_k, gamma_r, rtol=5e-3, atol=5e-4)
    np.testing.assert_allclose(read_k, read_r, rtol=5e-3, atol=5e-4)
    np.testing.assert_allclose(write_k, write_r, rtol=5e-3, atol=5e-4)
    print("KERNEL_OK")
</pallas_src>

<mosaic_0001>
module attributes {stable_mosaic.version = 11 : i64} {
  func.func @_gate_kernel(%arg0: i32, %arg1: memref<32x128xf32, #tpu.memory_space<vmem>>, %arg2: memref<32x1xf32, #tpu.memory_space<vmem>>, %arg3: memref<1x1xf32, #tpu.memory_space<smem>>, %arg4: memref<1x128xf32, #tpu.memory_space<vmem>>, %arg5: memref<1x128xf32, #tpu.memory_space<vmem>>) attributes {dimension_semantics = [#tpu.dimension_semantics<parallel>], iteration_bounds = array<i64: 1>, scalar_prefetch = 0 : i64, scratch_operands = 0 : i64, tpu.core_type = #tpu.core_type<tc>, window_params = [{transform_indices = @transform_0, window_bounds = array<i64: 32, 128>}, {pipeline_mode = #tpu.pipeline_mode<synchronous>, transform_indices = @transform_1, window_bounds = array<i64: 32, 1>}, {transform_indices = @transform_2, window_bounds = array<i64: 1, 1>}, {transform_indices = @transform_3, window_bounds = array<i64: 1, 128>}, {transform_indices = @transform_4, window_bounds = array<i64: 1, 128>}]} {
    %c0 = arith.constant 0 : index
    %c0_0 = arith.constant 0 : index
    %0 = vector.load %arg1[%c0, %c0_0] : memref<32x128xf32, #tpu.memory_space<vmem>>, vector<32x128xf32>
    %c0_1 = arith.constant 0 : index
    %c0_2 = arith.constant 0 : index
    %1 = vector.load %arg2[%c0_1, %c0_2] : memref<32x1xf32, #tpu.memory_space<vmem>>, vector<32x1xf32>
    %2 = vector.broadcast %1 : vector<32x1xf32> to vector<32x128xf32>
    %3 = arith.mulf %0, %2 : vector<32x128xf32>
    %cst = arith.constant dense<0.000000e+00> : vector<128xf32>
    %4 = vector.multi_reduction <add>, %3, %cst [0] : vector<32x128xf32> to vector<128xf32>
    %5 = vector.shape_cast %4 : vector<128xf32> to vector<1x128xf32>
    %c0_3 = arith.constant 0 : index
    %c0_4 = arith.constant 0 : index
    %6 = memref.load %arg3[%c0_3, %c0_4] : memref<1x1xf32, #tpu.memory_space<smem>>
    %7 = vector.broadcast %6 : f32 to vector<1x128xf32>
    %8 = arith.addf %5, %7 : vector<1x128xf32>
    %cst_5 = arith.constant 0.000000e+00 : f32
    %9 = vector.broadcast %cst_5 : f32 to vector<1x128xf32>
    %10 = arith.minimumf %8, %9 : vector<1x128xf32>
    %11 = math.absf %8 : vector<1x128xf32>
    %cst_6 = arith.constant 0.000000e+00 : f32
    %12 = vector.broadcast %cst_6 : f32 to vector<1x128xf32>
    %13 = arith.subf %12, %11 : vector<1x128xf32>
    %14 = math.exp %13 : vector<1x128xf32>
    %15 = math.log1p %14 : vector<1x128xf32>
    %16 = arith.subf %10, %15 : vector<1x128xf32>
    %c0_7 = arith.constant 0 : index
    %c0_8 = arith.constant 0 : index
    %17 = vector.load %arg4[%c0_7, %c0_8] : memref<1x128xf32, #tpu.memory_space<vmem>>, vector<1x128xf32>
    tpu.vector_store %arg4[%c0_7, %c0_8], %16 {strides = array<i32>} : memref<1x128xf32, #tpu.memory_space<vmem>>, vector<1x128xf32>,
    %18 = arith.subf %16, %8 : vector<1x128xf32>
    %c0_9 = arith.constant 0 : index
    %c0_10 = arith.constant 0 : index
    %19 = vector.load %arg5[%c0_9, %c0_10] : memref<1x128xf32, #tpu.memory_space<vmem>>, vector<1x128xf32>
    tpu.vector_store %arg5[%c0_9, %c0_10], %18 {strides = array<i32>} : memref<1x128xf32, #tpu.memory_space<vmem>>, vector<1x128xf32>,
    return
  }
  func.func @transform_0(%arg0: i32) -> (i32, i32) {
    %c0_i32 = arith.constant 0 : i32
    %c0_i32_0 = arith.constant 0 : i32
    return %c0_i32, %arg0 : i32, i32
  }
  func.func @transform_1(%arg0: i32) -> (i32, i32) {
    %c0_i32 = arith.constant 0 : i32
    %c0_i32_0 = arith.constant 0 : i32
    %c0_i32_1 = arith.constant 0 : i32
    return %c0_i32, %c0_i32_0 : i32, i32
  }
  func.func @transform_2(%arg0: i32) -> (i32, i32) {
    %c0_i32 = arith.constant 0 : i32
    %c0_i32_0 = arith.constant 0 : i32
    %c0_i32_1 = arith.constant 0 : i32
    return %c0_i32, %c0_i32_0 : i32, i32
  }
  func.func @transform_3(%arg0: i32) -> (i32, i32) {
    %c0_i32 = arith.constant 0 : i32
    %c0_i32_0 = arith.constant 0 : i32
    return %c0_i32, %arg0 : i32, i32
  }
  func.func @transform_4(%arg0: i32) -> (i32, i32) {
    %c0_i32 = arith.constant 0 : i32
    %c0_i32_0 = arith.constant 0 : i32
    return %c0_i32, %arg0 : i32, i32
  }
}

</mosaic_0001>

<bundles_post_ra>
// kernel: tpu_custom_call.1
= control target key start
LH: loop header
LB: loop body
LE: loop exit
PB: predicated region body
PF: predicated region fallthrough
CT: control target
= control target key end

     0   :  { %11 = vsyncpa [#allocation4], 0  ;;  %v166_v2 = vmov 0   ;;  %s253_s0 = inlined_call_operand.vmem [shape: f32[32,128], index: 0, kind: input, shape index: {}]   ;;  %s254_s1 = inlined_call_operand.vmem [shape: f32[32,1], index: 1, kind: input, shape index: {}]   ;;  %s255_s2 = inlined_call_operand.<no memory space> [shape: f32[1,1], index: 2, kind: input, shape index: {}]   ;;  %s256_s3 = inlined_call_operand.hbm [shape: f32[1,128], index: 3, kind: output, shape index: {0}]   ;;  %s257_s4 = inlined_call_operand.hbm [shape: f32[1,128], index: 4, kind: output, shape index: {1}]  }
   0x1   :  { %v25_v0 = vld [vmem:[%s254_s1 + $0x10] sm:$0xff]  ;;  %v23_v1 = vld [vmem:[%s254_s1] sm:$0xff]  ;;  %113 = vset.pattern.permute.xlu1 %v166_v2  ;;  %112 = vset.pattern.permute.xlu0 %v166_v2 }
   0x2   :  { %39 = vperm.xlu1 %113, %v25_v0   ;;  %29 = vperm.xlu0 %112, %v23_v1  }
   0x3   :  { %12 = vsyncpa [#allocation6], 0  ;;  %v26_v3 = vld [vmem:[%s254_s1 + $0x18] sm:$0xff]  ;;  %v24_v4 = vld [vmem:[%s254_s1 + $0x8] sm:$0xff]  ;;  %v61_v25 = vstv %s255_s2  ;;  %s168_s2 = smov [#allocation5]  }
   0x4   :  { %v19_v7 = vld [vmem:[%s253_s0] sm:$0xff]  ;;  %v20_v8 = vld [vmem:[%s253_s0 + $0x8] sm:$0xff]  ;;  %v21_v9 = vld [vmem:[%s253_s0 + $0x10] sm:$0xff]  ;;  %s97_s7 = sshll.u32 %s168_s2, 4  ;;  %s221_s7 = int_to_ptr.vmem [resolvable:$true] %s97_s7 }
   0x5   :  { %v22_v14 = vld [vmem:[%s253_s0 + $0x18] sm:$0xff]  ;;  %s167_s0 = smov [#allocation3]  }
   0x6   :  { %44 = vperm.xlu1 %113, %v26_v3   ;;  %34 = vperm.xlu0 %112, %v24_v4   ;;  %s87_s6 = sshll.u32 %s167_s0, 4  ;;  %s88_s6 = int_to_ptr.vmem [resolvable:$true] %s87_s6 }
   0x7   :  { %s118_s8 = scalar_lea.vmem %s88_s6, 16  ;;  %s122_s9 = scalar_lea.vmem %s88_s6, 32 }
   0x8   :  { %p119_p0 = scmp.ne.s32.totalorder %s88_s6, %s118_s8  ;;  %p123_p1 = scmp.lt.s32.totalorder %s88_s6, %s88_s6 }
   0x9   :  { %p124_p2 = scmp.lt.s32.totalorder %s122_s9, %s118_s8 }
   0xb   :  { %p125_p3 = por %p124_p2, %p123_p1 }
   0xd   :  { %p126_p4 = pnand %p125_p3, %p119_p0 }
  0x81   :  { %v40_v5 = vpop.permute.xlu1 %39  ;;  %v30_v6 = vpop.permute.xlu0 %29 }
  0x82   :  { %v47_v11 = vmul.f32 %v30_v6, %v19_v7  ;;  %v49_v15 = vmul.f32 %v40_v5, %v21_v9 }
  0x85   :  { %v35_v10 = vpop.permute.xlu0 %34  ;;  %v45_v13 = vpop.permute.xlu1 %44 }
  0x86   :  { %v48_v12 = vmul.f32 %v35_v10, %v20_v8  ;;  %v50_v17 = vmul.f32 %v45_v13, %v22_v14 }
  0x88   :  { %v51_v16 = vadd.f32 %v48_v12, %v47_v11 }
  0x8a   :  { %v52_v18 = vadd.f32 %v51_v16, %v49_v15 }
  0x8c   :  { %v53_v19 = vadd.f32 %v52_v18, %v50_v17 }
  0x8e   :  { %v54_v20 = vrot.slane %v53_v19, 4 }
  0x90   :  { %v55_v21 = vadd.f32 %v54_v20, %v53_v19 }
  0x92   :  { %v56_v22 = vrot.slane %v55_v21, 2 }
  0x94   :  { %v57_v23 = vadd.f32 %v56_v22, %v55_v21 }
  0x96   :  { %v58_v24 = vrot.slane %v57_v23, 1 }
  0x98   :  { %v59_v26 = vadd.f32 %v58_v24, %v57_v23 }
  0x9a   :  { %v62_v27 = vadd.f32 %v61_v25, %v59_v26 }
  0x9c   :  { %v64_v28 = vand.u32 2147483647, %v62_v27  ;;  %v63_v39 = vmin.f32 %v62_v27, 0.0 }
  0x9e   :  { %v65_v29 = vsub.f32 0.0, %v64_v28 }
  0xa0   :  { %v66_v30 = vmul.f32 1.442695, %v65_v29 }
  0xa2   :  { %114 = vpow2.f32 %v66_v30 }
  0xac   :  { %v115_v31 = vpop.eup %114 }
  0xad   :  { %v68_v32 = vadd.f32 1.0, %v115_v31  ;;  %v71_v33 = vmul.f32 -0.5, %v115_v31  ;;  %v74_v35 = vand.u32 2147483647, %v115_v31 }
  0xaf   :  { %116 = vlog2.f32 %v68_v32  ;;  %v72_v34 = vadd.f32 1.0, %v71_v33  ;;  %vm75_vm0 = vcmp.lt.f32.partialorder %v74_v35, 0.0004427343 }
  0xb1   :  { %v73_v38 = vmul.f32 %v115_v31, %v72_v34 }
  0xb9   :  { %v117_v36 = vpop.eup %116 }
  0xba   :  { %v70_v37 = vmul.f32 0.6931472, %v117_v36 }
  0xbc   :  { %v76_v40 = vsel %vm75_vm0, %v73_v38, %v70_v37 }
  0xbd   :  { %v77_v41 = vsub.f32 %v63_v39, %v76_v40 }
  0xbf   :  { %78 = vst [vmem:[#allocation3] sm:$0x1] %v77_v41  ;;  %v79_v42 = vsub.f32 %v77_v41, %v62_v27 }
  0xc0   :  { %129 = shalt.err (!%p126_p4)
}
  0xc1   :  { %s130_s12 = scalar_lea.hbm %s256_s3, 16 }
  0xc2   :  { %p131_p5 = scmp.ne.s32.totalorder %s256_s3, %s130_s12  ;;  %p134_p6 = scmp.lt.u32.totalorder %s130_s12, %s256_s3 }
  0xc4   :  { %p136_p7 = pnand %p134_p6, %p131_p5 }
  0xc6   :  { %139 = shalt.err (!%p136_p7)
}
  0xc7   :  { %90 = dma.vmem_to_hbm [thread:$0]  %s88_s6, 16, %s256_s3, [#allocation4]   ;;  %80 = vst [vmem:[#allocation5] sm:$0x1] %v79_v42 }
  0xc8   :  { %s140_s19 = scalar_lea.vmem %s221_s7, 16  ;;  %s144_s20 = scalar_lea.vmem %s221_s7, 32 }
  0xc9   :  { %p141_p8 = scmp.ne.s32.totalorder %s221_s7, %s140_s19  ;;  %p145_p9 = scmp.lt.s32.totalorder %s221_s7, %s221_s7 }
  0xca   :  { %p146_p10 = scmp.lt.s32.totalorder %s144_s20, %s140_s19 }
  0xcc   :  { %p147_p11 = por %p146_p10, %p145_p9 }
  0xce   :  { %p148_p12 = pnand %p147_p11, %p141_p8 }
  0xd0   :  { %151 = shalt.err (!%p148_p12)
}
  0xd1   :  { %s152_s23 = scalar_lea.hbm %s257_s4, 16 }
  0xd2   :  { %p153_p13 = scmp.ne.s32.totalorder %s257_s4, %s152_s23  ;;  %p156_p0 = scmp.lt.u32.totalorder %s152_s23, %s257_s4 }
  0xd4   :  { %p158_p1 = pnand %p156_p0, %p153_p13 }
  0xd6   :  { %161 = shalt.err (!%p158_p1)
}
  0xd7   :  { %100 = dma.vmem_to_hbm [thread:$0]  %s221_s7, 16, %s257_s4, [#allocation6]  }
  0xd8   :  { %162 = dma.done.wait [#allocation4], 16  }
  0xd9   :  { %163 = vsyncadd [#allocation4], 4294967280 }
  0xda   :  { %164 = dma.done.wait [#allocation6], 16  }
  0xdb   :  { %165 = vsyncadd [#allocation6], 4294967280 }
  0xdc   :  { %107 = vsyncpa [#allocation4], 1 }
  0xdd   :  { %108 = vsyncpa [#allocation6], 1 }

</bundles_post_ra>
